<compile_context>
chip_gen: v7x
topology: tpu7x:2x2x1
jax: 0.10.0
libtpu: 0.0.40
codegen_flags: <defaults>
</compile_context>

<pallas_src>
import functools

import jax
import jax.numpy as jnp
import numpy as np
from jax.experimental import pallas as pl
from jax.experimental.pallas import tpu as pltpu


_LANES = 128
_VMEM_LIMIT_BYTES = 32 * 1024 * 1024   # explicit scoped-VMEM limit (v5e/v6e/v7x safe)


def _vmem_capacity_bytes():
    try:
        return int(pltpu.get_tpu_info().vmem_capacity_bytes)
    except Exception:
        return 64 * 1024 * 1024         # conservative fallback (v7x per-TC VMEM)


def _fused_max_bytes():
    # Fused (single-read) path holds the x block + out block simultaneously
    # with no double buffering -> keep ~2*budget well under the scoped limit.
    return min(12 * 1024 * 1024, _vmem_capacity_bytes() // 8)


# ------------------------------ tiling helpers ------------------------------ #

def _choose_tile_rows(n_rows, lane_width, itemsize, *, target_bytes=4 << 20,
                      max_rows=8192):
    """Rows per tile: ~4 MiB of real (lane-dense) data, multiple of 8."""
    rows = target_bytes // max(1, lane_width * itemsize)
    rows = int(min(rows, max_rows, n_rows))
    if rows < n_rows:
        rows = max(8, rows - rows % 8)
    return max(1, rows)


def _sanitize_tile(tile, n_rows):
    tile = int(min(tile, n_rows))
    if tile < n_rows:
        tile = max(8, tile - tile % 8)
    return tile


def _lane_pack(x):
    """Row-major (N, F) -> (N/g, g*F) so the last dim is lane-dense.

    Returns (packed, g, pad_rows).  Pad rows are copies of the last row
    (min/max neutral); the caller slices them off the output."""
    n, f = x.shape
    if f % _LANES == 0 or _LANES % f != 0:
        return x, 1, 0
    g = _LANES // f
    pad = (-n) % g
    if pad:
        x = jnp.concatenate([x, jnp.broadcast_to(x[-1:], (pad, f))], axis=0)
    return x.reshape((n + pad) // g, g * f), g, pad


def _fold_lane_groups(v, op, num_features, groups):
    """Reduce the `groups` lane-copies of each feature (XLU rolls).

    v: (1, groups*num_features).  Result is lane-tiled: every lane holds its
    feature's reduction (so it can be used directly in the apply phase), and
    lanes [0, num_features) hold the per-feature values for the EMA."""
    out = v
    for k in range(1, groups):
        out = op(out, pltpu.roll(v, k * num_features, axis=1))
    return out


# ---------------------------------- kernels --------------------------------- #

def _fused_train_kernel(x_ref, rmin_ref, rmax_ref,
                        out_ref, nrmin_ref, nrmax_ref,
                        *, num_features, groups, to_min, to_max, momentum, eps):
    """Small/medium-N fast path: whole lane-packed x resident, 1 read + 1 write."""
    x = x_ref[...].astype(jnp.float32)                         # (rows, L)
    vmin = _fold_lane_groups(jnp.min(x, axis=0, keepdims=True), jnp.minimum,
                             num_features, groups)             # (1, L) lane-tiled
    vmax = _fold_lane_groups(jnp.max(x, axis=0, keepdims=True), jnp.maximum,
                             num_features, groups)
    nrmax_ref[...] = vmax * (1.0 - momentum) + rmax_ref[...] * momentum
    nrmin_ref[...] = vmin * (1.0 - momentum) + rmin_ref[...] * momentum
    slope = (to_max - to_min) * pl.reciprocal(vmax - vmin + eps, approx=False)
    # Keep (x - min) * slope + to_min form (avoids cancellation for
    # near-constant features where slope ~ 1/eps).
    out_ref[...] = ((x - vmin) * slope + to_min).astype(out_ref.dtype)


def _two_phase_train_kernel(x_ref, rmin_ref, rmax_ref,
                            out_ref, nrmin_ref, nrmax_ref,
                            min_sc, max_sc, lo_sc, slope_sc,
                            *, num_features, groups, to_min, to_max, momentum,
                            eps, n_rows, tile_rows, mask_last):
    """Streaming training: grid=(2, grid_n). Phase 0 = reduce+EMA, phase 1 = apply."""
    p = pl.program_id(0)
    i = pl.program_id(1)
    last = pl.num_programs(1) - 1

    @pl.when(p == 0)
    def _phase_reduce():
        @pl.when(i == 0)
        def _init():
            min_sc[...] = jnp.full(min_sc.shape, jnp.inf, min_sc.dtype)
            max_sc[...] = jnp.full(max_sc.shape, -jnp.inf, max_sc.dtype)

        x = x_ref[...].astype(jnp.float32)                     # (tile_rows, L)

        def accumulate(xmin_src, xmax_src):
            min_sc[...] = jnp.minimum(min_sc[...],
                                      jnp.min(xmin_src, axis=0, keepdims=True))
            max_sc[...] = jnp.maximum(max_sc[...],
                                      jnp.max(xmax_src, axis=0, keepdims=True))

        if mask_last:
            # Mask only the final (partial) tile; full tiles accumulate unmasked.
            @pl.when(i == last)
            def _masked():
                row = (jax.lax.broadcasted_iota(jnp.int32, x.shape, 0)
                       + i * tile_rows)
                valid = row < n_rows
                accumulate(jnp.where(valid, x, jnp.inf),
                           jnp.where(valid, x, -jnp.inf))

            @pl.when(i < last)
            def _unmasked():
                accumulate(x, x)
        else:
            accumulate(x, x)

        @pl.when(i == last)
        def _finalize():
            vmin = _fold_lane_groups(min_sc[...], jnp.minimum,
                                     num_features, groups)
            vmax = _fold_lane_groups(max_sc[...], jnp.maximum,
                                     num_features, groups)
            nrmax_ref[...] = vmax * (1.0 - momentum) + rmax_ref[...] * momentum
            nrmin_ref[...] = vmin * (1.0 - momentum) + rmin_ref[...] * momentum
            lo_sc[...] = vmin
            slope_sc[...] = (to_max - to_min) * pl.reciprocal(
                vmax - vmin + eps, approx=False)

    @pl.when(p == 1)
    def _phase_apply():
        x = x_ref[...].astype(jnp.float32)
        out_ref[...] = ((x - lo_sc[...]) * slope_sc[...]
                        + to_min).astype(out_ref.dtype)


def _apply_kernel(x_ref, lo_ref, hi_ref, out_ref, *, to_min, to_max, eps):
    """Eval pass: out = (x - lo) * slope + to_min, tiled over points."""
    lo = lo_ref[...]                                           # (1, L) fp32
    hi = hi_ref[...]
    slope = (to_max - to_min) * pl.reciprocal(hi - lo + eps, approx=False)
    x = x_ref[...].astype(jnp.float32)
    out_ref[...] = ((x - lo) * slope + to_min).astype(out_ref.dtype)


# --------------------------------- wrappers ---------------------------------- #

def _train_fused_call(xp, rmin_l, rmax_l, *, num_features, groups,
                      to_min, to_max, momentum, eps):
    n_rows, lanes = xp.shape
    kernel = functools.partial(
        _fused_train_kernel, num_features=num_features, groups=groups,
        to_min=float(to_min), to_max=float(to_max),
        momentum=float(momentum), eps=float(eps))
    return pl.pallas_call(
        kernel,
        out_shape=(
            jax.ShapeDtypeStruct((n_rows, lanes), xp.dtype),
            jax.ShapeDtypeStruct((1, lanes), jnp.float32),
            jax.ShapeDtypeStruct((1, lanes), jnp.float32),
        ),
        compiler_params=pltpu.CompilerParams(
            vmem_limit_bytes=_VMEM_LIMIT_BYTES),
    )(xp, rmin_l, rmax_l)


def _train_streaming_call(xp, rmin_l, rmax_l, *, num_features, groups,
                          to_min, to_max, momentum, eps, tile_rows):
    n_rows, lanes = xp.shape
    tile = _sanitize_tile(tile_rows, n_rows)
    grid_n = pl.cdiv(n_rows, tile)
    mask_last = (n_rows % tile) != 0

    kernel = functools.partial(
        _two_phase_train_kernel, num_features=num_features, groups=groups,
        to_min=float(to_min), to_max=float(to_max),
        momentum=float(momentum), eps=float(eps),
        n_rows=n_rows, tile_rows=tile, mask_last=mask_last)

    return pl.pallas_call(
        kernel,
        grid=(2, grid_n),
        in_specs=[
            pl.BlockSpec((tile, lanes), lambda p, i: (i, 0)),
            pl.BlockSpec((1, lanes), lambda p, i: (0, 0)),
            pl.BlockSpec((1, lanes), lambda p, i: (0, 0)),
        ],
        out_specs=(
            # Phase 0 parks the output on block 0 (never written, never
            # flushed mid-phase); phase 1 streams blocks 0..grid_n-1 with
            # full-lane-width unmasked stores.
            pl.BlockSpec((tile, lanes), lambda p, i: (i * p, 0)),
            pl.BlockSpec((1, lanes), lambda p, i: (0, 0)),
            pl.BlockSpec((1, lanes), lambda p, i: (0, 0)),
        ),
        out_shape=(
            jax.ShapeDtypeStruct((n_rows, lanes), xp.dtype),
            jax.ShapeDtypeStruct((1, lanes), jnp.float32),
            jax.ShapeDtypeStruct((1, lanes), jnp.float32),
        ),
        scratch_shapes=[
            pltpu.VMEM((1, lanes), jnp.float32),   # min accumulator
            pltpu.VMEM((1, lanes), jnp.float32),   # max accumulator
            pltpu.VMEM((1, lanes), jnp.float32),   # lo   (lane-tiled, phase 1)
            pltpu.VMEM((1, lanes), jnp.float32),   # slope(lane-tiled, phase 1)
        ],
        compiler_params=pltpu.CompilerParams(
            dimension_semantics=("arbitrary", "arbitrary"),
            vmem_limit_bytes=_VMEM_LIMIT_BYTES),
    )(xp, rmin_l, rmax_l)


def _apply_call(xp, lo_l, hi_l, *, to_min, to_max, eps, tile_rows):
    n_rows, lanes = xp.shape
    tile = _sanitize_tile(tile_rows, n_rows)
    grid_n = pl.cdiv(n_rows, tile)
    kernel = functools.partial(_apply_kernel, to_min=float(to_min),
                               to_max=float(to_max), eps=float(eps))
    return pl.pallas_call(
        kernel,
        grid=(grid_n,),
        in_specs=[
            pl.BlockSpec((tile, lanes), lambda i: (i, 0)),
            pl.BlockSpec((1, lanes), lambda i: (0, 0)),
            pl.BlockSpec((1, lanes), lambda i: (0, 0)),
        ],
        out_specs=pl.BlockSpec((tile, lanes), lambda i: (i, 0)),
        out_shape=jax.ShapeDtypeStruct((n_rows, lanes), xp.dtype),
        compiler_params=pltpu.CompilerParams(
            dimension_semantics=("parallel",),
            vmem_limit_bytes=_VMEM_LIMIT_BYTES),
    )(xp, lo_l, hi_l)


def maxmin_ma_layernorm_train(x, running_min, running_max, *, to_min, to_max,
                              momentum=0.8, eps=1e-8, tile_n=None):
    """Training forward.  Returns (out, new_running_min, new_running_max).

    `tile_n` (optional) is the tile row count in the LANE-PACKED layout, i.e.
    tile_n packed rows == tile_n * (128 // num_features) original points."""
    if x.ndim != 2:
        # TODO(synk): batched (B, N, F) inputs (PyTorch's mean-over-leading-dims
        # EMA path) are not implemented; only 2-D (points, features).
        raise ValueError("expected 2-D (num_points, num_features) input")
    n, f = x.shape
    xp, g, _pad = _lane_pack(x)
    lanes = xp.shape[1]
    rmin_l = jnp.tile(jnp.asarray(running_min, jnp.float32).reshape(1, f), (1, g))
    rmax_l = jnp.tile(jnp.asarray(running_max, jnp.float32).reshape(1, f), (1, g))

    x_bytes = xp.size * xp.dtype.itemsize
    if tile_n is None and x_bytes <= _fused_max_bytes():
        out_p, nrmin, nrmax = _train_fused_call(
            xp, rmin_l, rmax_l, num_features=f, groups=g,
            to_min=to_min, to_max=to_max, momentum=momentum, eps=eps)
    else:
        tile = tile_n if tile_n is not None else _choose_tile_rows(
            xp.shape[0], lanes, xp.dtype.itemsize)
        out_p, nrmin, nrmax = _train_streaming_call(
            xp, rmin_l, rmax_l, num_features=f, groups=g,
            to_min=to_min, to_max=to_max, momentum=momentum, eps=eps,
            tile_rows=tile)

    out = out_p.reshape(-1, f)[:n]       # row-major no-op reshape + drop pad rows
    return out, nrmin[0, :f], nrmax[0, :f]


def maxmin_ma_layernorm_eval(x, running_min, running_max, *, to_min, to_max,
                             eps=1e-8, tile_n=None):
    """Eval forward using the running (moving-average) min/max buffers."""
    if x.ndim != 2:
        raise ValueError("expected 2-D (num_points, num_features) input")
    n, f = x.shape
    xp, g, _pad = _lane_pack(x)
    lanes = xp.shape[1]
    lo_l = jnp.tile(jnp.asarray(running_min, jnp.float32).reshape(1, f), (1, g))
    hi_l = jnp.tile(jnp.asarray(running_max, jnp.float32).reshape(1, f), (1, g))
    tile = tile_n if tile_n is not None else _choose_tile_rows(
        xp.shape[0], lanes, xp.dtype.itemsize)
    out_p = _apply_call(xp, lo_l, hi_l, to_min=to_min, to_max=to_max, eps=eps,
                        tile_rows=tile)
    return out_p.reshape(-1, f)[:n]


# -------------------------------- references --------------------------------- #

def _train_reference(x, running_min, running_max, *, to_min, to_max,
                     momentum, eps):
    x32 = x.astype(jnp.float32)
    min_t = jnp.min(x32, axis=-2)
    max_t = jnp.max(x32, axis=-2)
    new_rmax = max_t * (1.0 - momentum) + running_max * momentum
    new_rmin = min_t * (1.0 - momentum) + running_min * momentum
    slope = (to_max - to_min) / (max_t - min_t + eps)
    out = (slope * (x32 - min_t) + to_min).astype(x.dtype)
    return out, new_rmin, new_rmax


def _eval_reference(x, running_min, running_max, *, to_min, to_max, eps):
    x32 = x.astype(jnp.float32)
    slope = (to_max - to_min) / (running_max - running_min + eps)
    return (slope * (x32 - running_min) + to_min).astype(x.dtype)


# ----------------------------------- main ------------------------------------ #

if __name__ == "__main__":
    to_min, to_max = -1.0, 1.0
    num_features = 32
    momentum = 0.8
    eps = 1e-8

    key = jax.random.PRNGKey(0)
    k1, k2 = jax.random.split(key)

    # Registered buffers: ones(num_features) * to_min / to_max.
    running_min = jnp.ones((num_features,), jnp.float32) * to_min
    running_max = jnp.ones((num_features,), jnp.float32) * to_max

    # --- Case 1: small N -> lane-packed fused single-read path --------------- #
    N1 = 64
    x1 = jax.random.normal(k1, (N1, num_features), jnp.float32) * 3.0 + 0.5
    out1, rmin1, rmax1 = maxmin_ma_layernorm_train(
        x1, running_min, running_max,
        to_min=to_min, to_max=to_max, momentum=momentum, eps=eps)
    jax.block_until_ready((out1, rmin1, rmax1))

    ref_out1, ref_rmin1, ref_rmax1 = _train_reference(
        x1, running_min, running_max,
        to_min=to_min, to_max=to_max, momentum=momentum, eps=eps)
    np.testing.assert_allclose(np.asarray(out1), np.asarray(ref_out1),
                               rtol=1e-5, atol=1e-5)
    np.testing.assert_allclose(np.asarray(rmin1), np.asarray(ref_rmin1),
                               rtol=1e-5, atol=1e-5)
    np.testing.assert_allclose(np.asarray(rmax1), np.asarray(ref_rmax1),
                               rtol=1e-5, atol=1e-5)

    # --- Case 2: larger N, explicit tile -> two-phase streaming path ---------- #
    # N2 not a multiple of 4 exercises lane-pack padding; packed rows (130) not
    # a multiple of the tile (32) exercises last-tile masking.
    N2, TILE_ROWS = 518, 32
    x2 = jax.random.normal(k2, (N2, num_features), jnp.float32) * 2.0 - 1.0
    out2, rmin2, rmax2 = maxmin_ma_layernorm_train(
        x2, running_min, running_max,
        to_min=to_min, to_max=to_max, momentum=momentum, eps=eps,
        tile_n=TILE_ROWS)
    jax.block_until_ready((out2, rmin2, rmax2))

    ref_out2, ref_rmin2, ref_rmax2 = _train_reference(
        x2, running_min, running_max,
        to_min=to_min, to_max=to_max, momentum=momentum, eps=eps)
    np.testing.assert_allclose(np.asarray(out2), np.asarray(ref_out2),
                               rtol=1e-5, atol=1e-5)
    np.testing.assert_allclose(np.asarray(rmin2), np.asarray(ref_rmin2),
                               rtol=1e-5, atol=1e-5)
    np.testing.assert_allclose(np.asarray(rmax2), np.asarray(ref_rmax2),
                               rtol=1e-5, atol=1e-5)

    # --- Case 3: eval path (tiled, lane-packed, uses updated buffers) --------- #
    out_eval = maxmin_ma_layernorm_eval(
        x2, rmin2, rmax2, to_min=to_min, to_max=to_max, eps=eps,
        tile_n=TILE_ROWS)
    jax.block_until_ready(out_eval)

    ref_eval = _eval_reference(x2, rmin2, rmax2,
                               to_min=to_min, to_max=to_max, eps=eps)
    np.testing.assert_allclose(np.asarray(out_eval), np.asarray(ref_eval),
                               rtol=1e-5, atol=1e-5)

    print("KERNEL_OK")
</pallas_src>

<mosaic_0001>
module attributes {stable_mosaic.version = 11 : i64} {
  func.func @_fused_train_kernel(%arg0: memref<16x128xf32, #tpu.memory_space<vmem>>, %arg1: memref<1x128xf32, #tpu.memory_space<vmem>>, %arg2: memref<1x128xf32, #tpu.memory_space<vmem>>, %arg3: memref<16x128xf32, #tpu.memory_space<vmem>>, %arg4: memref<1x128xf32, #tpu.memory_space<vmem>>, %arg5: memref<1x128xf32, #tpu.memory_space<vmem>>) attributes {dimension_semantics = [], scalar_prefetch = 0 : i64, scratch_operands = 0 : i64, tpu.core_type = #tpu.core_type<tc>} {
    %c0 = arith.constant 0 : index
    %c0_0 = arith.constant 0 : index
    %0 = vector.load %arg0[%c0, %c0_0] : memref<16x128xf32, #tpu.memory_space<vmem>>, vector<16x128xf32>
    %cst = arith.constant dense<0x7F800000> : vector<128xf32>
    %1 = vector.multi_reduction <minimumf>, %0, %cst [0] : vector<16x128xf32> to vector<128xf32>
    %2 = vector.shape_cast %1 : vector<128xf32> to vector<1x128xf32>
    %c32_i32 = arith.constant 32 : i32
    %3 = tpu.dynamic_rotate %2 by %c32_i32 dim 1 : vector<1x128xf32>, i32 -> vector<1x128xf32>
    %4 = arith.minimumf %2, %3 : vector<1x128xf32>
    %c64_i32 = arith.constant 64 : i32
    %5 = tpu.dynamic_rotate %2 by %c64_i32 dim 1 : vector<1x128xf32>, i32 -> vector<1x128xf32>
    %6 = arith.minimumf %4, %5 : vector<1x128xf32>
    %c96_i32 = arith.constant 96 : i32
    %7 = tpu.dynamic_rotate %2 by %c96_i32 dim 1 : vector<1x128xf32>, i32 -> vector<1x128xf32>
    %8 = arith.minimumf %6, %7 : vector<1x128xf32>
    %cst_1 = arith.constant dense<0xFF800000> : vector<128xf32>
    %9 = vector.multi_reduction <maximumf>, %0, %cst_1 [0] : vector<16x128xf32> to vector<128xf32>
    %10 = vector.shape_cast %9 : vector<128xf32> to vector<1x128xf32>
    %c32_i32_2 = arith.constant 32 : i32
    %11 = tpu.dynamic_rotate %10 by %c32_i32_2 dim 1 : vector<1x128xf32>, i32 -> vector<1x128xf32>
    %12 = arith.maximumf %10, %11 : vector<1x128xf32>
    %c64_i32_3 = arith.constant 64 : i32
    %13 = tpu.dynamic_rotate %10 by %c64_i32_3 dim 1 : vector<1x128xf32>, i32 -> vector<1x128xf32>
    %14 = arith.maximumf %12, %13 : vector<1x128xf32>
    %c96_i32_4 = arith.constant 96 : i32
    %15 = tpu.dynamic_rotate %10 by %c96_i32_4 dim 1 : vector<1x128xf32>, i32 -> vector<1x128xf32>
    %16 = arith.maximumf %14, %15 : vector<1x128xf32>
    %cst_5 = arith.constant 2.000000e-01 : f32
    %17 = vector.broadcast %cst_5 : f32 to vector<1x128xf32>
    %18 = arith.mulf %16, %17 : vector<1x128xf32>
    %c0_6 = arith.constant 0 : index
    %c0_7 = arith.constant 0 : index
    %19 = vector.load %arg2[%c0_6, %c0_7] : memref<1x128xf32, #tpu.memory_space<vmem>>, vector<1x128xf32>
    %cst_8 = arith.constant 8.000000e-01 : f32
    %20 = vector.broadcast %cst_8 : f32 to vector<1x128xf32>
    %21 = arith.mulf %19, %20 : vector<1x128xf32>
    %22 = arith.addf %18, %21 : vector<1x128xf32>
    %c0_9 = arith.constant 0 : index
    %c0_10 = arith.constant 0 : index
    %23 = vector.load %arg5[%c0_9, %c0_10] : memref<1x128xf32, #tpu.memory_space<vmem>>, vector<1x128xf32>
    tpu.vector_store %arg5[%c0_9, %c0_10], %22 {strides = array<i32>} : memref<1x128xf32, #tpu.memory_space<vmem>>, vector<1x128xf32>,
    %cst_11 = arith.constant 2.000000e-01 : f32
    %24 = vector.broadcast %cst_11 : f32 to vector<1x128xf32>
    %25 = arith.mulf %8, %24 : vector<1x128xf32>
    %c0_12 = arith.constant 0 : index
    %c0_13 = arith.constant 0 : index
    %26 = vector.load %arg1[%c0_12, %c0_13] : memref<1x128xf32, #tpu.memory_space<vmem>>, vector<1x128xf32>
    %cst_14 = arith.constant 8.000000e-01 : f32
    %27 = vector.broadcast %cst_14 : f32 to vector<1x128xf32>
    %28 = arith.mulf %26, %27 : vector<1x128xf32>
    %29 = arith.addf %25, %28 : vector<1x128xf32>
    %c0_15 = arith.constant 0 : index
    %c0_16 = arith.constant 0 : index
    %30 = vector.load %arg4[%c0_15, %c0_16] : memref<1x128xf32, #tpu.memory_space<vmem>>, vector<1x128xf32>
    tpu.vector_store %arg4[%c0_15, %c0_16], %29 {strides = array<i32>} : memref<1x128xf32, #tpu.memory_space<vmem>>, vector<1x128xf32>,
    %31 = arith.subf %16, %8 : vector<1x128xf32>
    %cst_17 = arith.constant 9.99999993E-9 : f32
    %32 = vector.broadcast %cst_17 : f32 to vector<1x128xf32>
    %33 = arith.addf %31, %32 : vector<1x128xf32>
    %34 = tpu.reciprocal %33 : vector<1x128xf32> -> vector<1x128xf32>
    %cst_18 = arith.constant 2.000000e+00 : f32
    %35 = vector.broadcast %cst_18 : f32 to vector<1x128xf32>
    %36 = arith.mulf %35, %34 : vector<1x128xf32>
    %37 = vector.broadcast %8 : vector<1x128xf32> to vector<16x128xf32>
    %38 = arith.subf %0, %37 : vector<16x128xf32>
    %39 = vector.broadcast %36 : vector<1x128xf32> to vector<16x128xf32>
    %40 = arith.mulf %38, %39 : vector<16x128xf32>
    %cst_19 = arith.constant -1.000000e+00 : f32
    %41 = vector.broadcast %cst_19 : f32 to vector<16x128xf32>
    %42 = arith.addf %40, %41 : vector<16x128xf32>
    %c0_20 = arith.constant 0 : index
    %c0_21 = arith.constant 0 : index
    %43 = vector.load %arg3[%c0_20, %c0_21] : memref<16x128xf32, #tpu.memory_space<vmem>>, vector<16x128xf32>
    tpu.vector_store %arg3[%c0_20, %c0_21], %42 {strides = array<i32>} : memref<16x128xf32, #tpu.memory_space<vmem>>, vector<16x128xf32>,
    return
  }
}

</mosaic_0001>

<bundles_post_ra>
// kernel: tpu_custom_call.1
= control target key start
LH: loop header
LB: loop body
LE: loop exit
PB: predicated region body
PF: predicated region fallthrough
CT: control target
= control target key end

     0   :  { %11 = vsyncpa [#allocation3], 0  ;;  %s363_s0 = inlined_call_operand.hbm [shape: f32[16,128], index: 0, kind: input, shape index: {}]   ;;  %s364_s1 = inlined_call_operand.vmem [shape: f32[1,128], index: 1, kind: input, shape index: {}]   ;;  %s365_s2 = inlined_call_operand.vmem [shape: f32[1,128], index: 2, kind: input, shape index: {}]   ;;  %s366_s3 = inlined_call_operand.hbm [shape: f32[16,128], index: 3, kind: output, shape index: {0}]   ;;  %s367_s4 = inlined_call_operand.hbm [shape: f32[1,128], index: 4, kind: output, shape index: {1}]   ;;  %s368_s5 = inlined_call_operand.hbm [shape: f32[1,128], index: 5, kind: output, shape index: {2}]  }
   0x1   :  { %12 = vsyncpa [#allocation4], 0 }
   0x2   :  { %13 = vsyncpa [#allocation7], 0  ;;  %s246_s18 = smov [#allocation2]   ;;  %s152_s22 = scalar_lea.hbm %s363_s0, 256 }
   0x3   :  { %s19_s19 = sshll.u32 %s246_s18, 4  ;;  %p153_p0 = scmp.ne.s32.totalorder %s363_s0, %s152_s22  ;;  %s20_s19 = int_to_ptr.vmem [resolvable:$true] %s19_s19 }
   0x4   :  { %p156_p1 = scmp.lt.u32.totalorder %s152_s22, %s363_s0 }
   0x6   :  { %p158_p2 = pnand %p156_p1, %p153_p0 }
   0x8   :  { %161 = shalt.err (!%p158_p2)
}
   0x9   :  { %s162_s27 = scalar_lea.vmem %s20_s19, 256  ;;  %p167_p4 = scmp.lt.s32.totalorder %s20_s19, %s20_s19 }
   0xa   :  { %p163_p3 = scmp.ne.s32.totalorder %s20_s19, %s162_s27  ;;  %p168_p5 = scmp.lt.s32.totalorder %s162_s27, %s162_s27 }
   0xc   :  { %p169_p6 = por %p168_p5, %p167_p4 }
   0xe   :  { %p170_p7 = pnand %p169_p6, %p163_p3 }
  0x10   :  { %173 = shalt.err (!%p170_p7)
}
  0x11   :  { %s247_s28 = smov 128   ;;  %s248_s29 = smov 8  }
  0x12   :  { %25 = dma.hbm_to_vmem [thread:$0]  %s363_s0, 256, %s20_s19, [#allocation3], %s247_s28, %s247_s28, %s248_s29  }
  0x13   :  { %240 = dma.done.wait [#allocation3], 256  }
  0x14   :  { %241 = vsyncadd [#allocation3], 4294967040  ;;  %v300_v0 = vld [vmem:[#allocation2] sm:$0xff]  ;;  %v302_v1 = vld [vmem:[#allocation2 + $0x8] sm:$0xff]  ;;  %s249_s0 = smov 64   ;;  %s250_s7 = smov 32   ;;  %v81_v35 = vlaneseq }
  0x15   :  { %v35_v2 = vmin.f32 %v300_v0, %v302_v1  ;;  %v51_v3 = vmax.f32 %v300_v0, %v302_v1  ;;  %s251_s8 = smov 96   ;;  %v68_v22 = vld [vmem:[%s365_s2] sm:$0x1]  ;;  %s252_s13 = smov [#allocation6]  }
  0x16   :  { %v73_v25 = vld [vmem:[%s364_s1] sm:$0x1]  ;;  %v69_v28 = vmul.f32 0.8, %v68_v22  ;;  %s115_s14 = sshll.u32 %s252_s13, 4  ;;  %s253_s15 = smov [#allocation8]   ;;  %s116_s14 = int_to_ptr.vmem [resolvable:$true] %s115_s14 }
  0x17   :  { %v36_v4 = vrot.slane %v35_v2, 4  ;;  %v52_v5 = vrot.slane %v51_v3, 4  ;;  %v74_v31 = vmul.f32 0.8, %v73_v25  ;;  %s125_s2 = sshll.u32 %s253_s15, 4  ;;  %v82_v39 = vshrl.u32 %v81_v35, 7  ;;  %p179_p9 = scmp.lt.s32.totalorder %s116_s14, %s116_s14  ;;  %s314_s2 = int_to_ptr.vmem [resolvable:$true] %s125_s2 }
  0x18   :  { %s174_s1 = scalar_lea.vmem %s116_s14, 16  ;;  %s178_s16 = scalar_lea.vmem %s116_s14, 32 }
  0x19   :  { %v37_v6 = vmin.f32 %v35_v2, %v36_v4  ;;  %v53_v7 = vmax.f32 %v51_v3, %v52_v5  ;;  %p175_p8 = scmp.ne.s32.totalorder %s116_s14, %s174_s1  ;;  %p180_p10 = scmp.lt.s32.totalorder %s178_s16, %s174_s1 }
  0x1b   :  { %v38_v8 = vrot.slane %v37_v6, 2  ;;  %v54_v9 = vrot.slane %v53_v7, 2  ;;  %p181_p11 = por %p180_p10, %p179_p9 }
  0x1d   :  { %v39_v10 = vmin.f32 %v37_v6, %v38_v8  ;;  %v55_v11 = vmax.f32 %v53_v7, %v54_v9  ;;  %p182_p12 = pnand %p181_p11, %p175_p8 }
  0x1f   :  { %v40_v12 = vrot.slane %v39_v10, 1  ;;  %v56_v13 = vrot.slane %v55_v11, 1 }
  0x21   :  { %v41_v14 = vmin.f32 %v39_v10, %v40_v12  ;;  %v57_v15 = vmax.f32 %v55_v11, %v56_v13 }
  0x23   :  { %45 = vrot.lane.b32.xlu1 %v41_v14, %s249_s0  ;;  %42 = vrot.lane.b32.xlu0 %v41_v14, %s250_s7 }
  0x27   :  { %61 = vrot.lane.b32.xlu1 %v57_v15, %s249_s0  ;;  %58 = vrot.lane.b32.xlu0 %v57_v15, %s250_s7 }
  0x2b   :  { %64 = vrot.lane.b32.xlu1 %v57_v15, %s251_s8  ;;  %48 = vrot.lane.b32.xlu0 %v41_v14, %s251_s8 }
  0x95   :  { %v46_v16 = vpop.permute.xlu1 %45  ;;  %v43_v17 = vpop.permute.xlu0 %42 }
  0x96   :  { %v44_v18 = vmin.f32 %v41_v14, %v43_v17 }
  0x98   :  { %v47_v24 = vmin.f32 %v44_v18, %v46_v16 }
  0x99   :  { %v62_v19 = vpop.permute.xlu1 %61  ;;  %v59_v20 = vpop.permute.xlu0 %58 }
  0x9a   :  { %v60_v21 = vmax.f32 %v57_v15, %v59_v20 }
  0x9c   :  { %v63_v23 = vmax.f32 %v60_v21, %v62_v19 }
  0x9d   :  { %v65_v26 = vpop.permute.xlu1 %64  ;;  %v49_v27 = vpop.permute.xlu0 %48 }
  0x9e   :  { %v66_v29 = vmax.f32 %v63_v23, %v65_v26  ;;  %v50_v30 = vmin.f32 %v47_v24, %v49_v27 }
  0xa0   :  { %v67_v32 = vmul.f32 0.2, %v66_v29  ;;  %v72_v33 = vmul.f32 0.2, %v50_v30  ;;  %v77_v34 = vsub.f32 %v66_v29, %v50_v30 }
  0xa2   :  { %v70_v36 = vadd.f32 %v69_v28, %v67_v32  ;;  %v78_v37 = vadd.f32 1e-08, %v77_v34  ;;  %v75_v38 = vadd.f32 %v74_v31, %v72_v33 }
  0xa4   :  { %71 = vst [vmem:[#allocation8] sm:$0x1] %v70_v36  ;;  %150 = vrcp.f32 %v78_v37  ;;  %76 = vst [vmem:[#allocation6] sm:$0x1] %v75_v38 }
  0xa5   :  { %185 = shalt.err (!%p182_p12)
}
  0xa6   :  { %s186_s19 = scalar_lea.hbm %s367_s4, 16 }
  0xa7   :  { %p187_p13 = scmp.ne.s32.totalorder %s367_s4, %s186_s19  ;;  %p190_p0 = scmp.lt.u32.totalorder %s186_s19, %s367_s4 }
  0xa9   :  { %p192_p1 = pnand %p190_p0, %p187_p13 }
  0xab   :  { %195 = shalt.err (!%p192_p1)
}
  0xac   :  { %118 = dma.vmem_to_hbm [thread:$0]  %s116_s14, 16, %s367_s4, [#allocation7]  }
  0xad   :  { %s196_s26 = scalar_lea.vmem %s314_s2, 16  ;;  %s200_s27 = scalar_lea.vmem %s314_s2, 32 }
  0xae   :  { %p197_p2 = scmp.ne.s32.totalorder %s314_s2, %s196_s26  ;;  %p201_p3 = scmp.lt.s32.totalorder %s314_s2, %s314_s2 }
  0xaf   :  { %p202_p4 = scmp.lt.s32.totalorder %s200_s27, %s196_s26 }
  0xb1   :  { %p203_p5 = por %p202_p4, %p201_p3 }
  0xb3   :  { %p204_p6 = pnand %p203_p5, %p197_p2 }
  0xb5   :  { %207 = shalt.err (!%p204_p6)
}
  0xb6   :  { %s208_s0 = scalar_lea.hbm %s368_s5, 16 }
  0xb7   :  { %p209_p7 = scmp.ne.s32.totalorder %s368_s5, %s208_s0  ;;  %p212_p8 = scmp.lt.u32.totalorder %s208_s0, %s368_s5 }
  0xb9   :  { %p214_p9 = pnand %p212_p8, %p209_p7 }
  0xbb   :  { %217 = shalt.err (!%p214_p9)
}
  0xbc   :  { %128 = dma.vmem_to_hbm [thread:$0]  %s314_s2, 16, %s368_s5, [#allocation7]   ;;  %v83_v40 = vsub.s32 0, %v82_v39  ;;  %v151_v42 = vpop.eup %150 }
  0xbd   :  { %v80_v43 = vmul.f32 2.0, %v151_v42  ;;  %s254_s12 = smov [#allocation5]  }
  0xbe   :  { %v84_v41 = vrot.slane %v50_v30, %v83_v40  ;;  %s102_s13 = sshll.u32 %s254_s12, 4  ;;  %s103_s13 = int_to_ptr.vmem [resolvable:$true] %s102_s13 }
  0xbf   :  { %v90_v46 = vrot.slane %v80_v43, %v83_v40  ;;  %s218_s14 = scalar_lea.vmem %s103_s13, 256  ;;  %p223_p11 = scmp.lt.s32.totalorder %s103_s13, %s103_s13 }
  0xc0   :  { %v85_v44 = vsub.f32 %v300_v0, %v84_v41  ;;  %v86_v45 = vsub.f32 %v302_v1, %v84_v41  ;;  %p219_p10 = scmp.ne.s32.totalorder %s103_s13, %s218_s14  ;;  %p224_p12 = scmp.lt.s32.totalorder %s218_s14, %s218_s14 }
  0xc2   :  { %v91_v47 = vmul.f32 %v90_v46, %v85_v44  ;;  %v92_v48 = vmul.f32 %v90_v46, %v86_v45  ;;  %p225_p13 = por %p224_p12, %p223_p11 }
  0xc4   :  { %v93_v49 = vadd.f32 -1.0, %v91_v47  ;;  %v94_v50 = vadd.f32 -1.0, %v92_v48  ;;  %p226_p0 = pnand %p225_p13, %p219_p10 }
  0xc6   :  { %95 = vst [vmem:[#allocation5] sm:$0xff] %v93_v49  ;;  %96 = vst [vmem:[#allocation5 + $0x8] sm:$0xff] %v94_v50 }
  0xc7   :  { %229 = shalt.err (!%p226_p0)
}
  0xc8   :  { %s230_s2 = scalar_lea.hbm %s366_s3, 256 }
  0xc9   :  { %p231_p1 = scmp.ne.s32.totalorder %s366_s3, %s230_s2  ;;  %p234_p2 = scmp.lt.u32.totalorder %s230_s2, %s366_s3 }
  0xcb   :  { %p236_p3 = pnand %p234_p2, %p231_p1 }
  0xcd   :  { %239 = shalt.err (!%p236_p3)
}
  0xce   :  { %108 = dma.vmem_to_hbm [thread:$0]  %s103_s13, 256, %s366_s3, [#allocation4], %s247_s28, %s247_s28, %s248_s29  }
  0xcf   :  { %242 = dma.done.wait [#allocation4], 256  }
  0xd0   :  { %243 = vsyncadd [#allocation4], 4294967040 }
  0xd1   :  { %244 = dma.done.wait [#allocation7], 32  }
  0xd2   :  { %245 = vsyncadd [#allocation7], 4294967264 }
  0xd3   :  { %138 = vsyncpa [#allocation3], 1 }
  0xd4   :  { %139 = vsyncpa [#allocation4], 1 }
  0xd5   :  { %140 = vsyncpa [#allocation7], 1 }

</bundles_post_ra>
